<compile_context>
chip_gen: v6e
topology: v6e:2x2x1
jax: 0.10.0
libtpu: 0.0.40
codegen_flags: <defaults>
</compile_context>

<pallas_src>
import jax
import jax.numpy as jnp
from jax import lax
from jax.experimental import pallas as pl
from jax.experimental.pallas import tpu as pltpu


def _chart_head_kernel(x_ref, wt_ref, b_ref, lab_ref, logits_ref, loss_ref):
    """Fused Linear + softmax-cross-entropy (ignore_index=-100, mean over valid rows).

    x_ref:      (B, H)   native dtype (bf16/f32), VMEM   encoder_hidden_states[-1][:, 0]
    wt_ref:     (H, Cp)  native dtype, VMEM              chart_classifier.weight, pre-transposed,
                                                         lane-padded to Cp (multiple of 128)
    b_ref:      (1, Cp)  f32, VMEM                       bias; padded columns hold -1e30
    lab_ref:    (B, 1)   int32, VMEM                     chart_label
    logits_ref: (B, Cp)  f32, VMEM                       lane-dense logits (wrapper slices to C)
    loss_ref:   (1,)     f32, SMEM                       scalar loss
    """
    B = x_ref.shape[0]
    Cp = wt_ref.shape[1]

    # (B, H) @ (H, Cp) on the MXU with f32 accumulation; padded cols -> -1e30 via the bias.
    logits = jnp.dot(x_ref[...], wt_ref[...],
                     preferred_element_type=jnp.float32) + b_ref[...]
    logits_ref[...] = logits  # unmasked lane-dense store (Cp is a multiple of 128)

    # Vectorized cross-entropy with ignore_index=-100 over the whole (B, Cp) block.
    labels = lab_ref[...]                                         # (B, 1) int32
    col = lax.broadcasted_iota(jnp.int32, (B, Cp), 1)             # (B, Cp)

    m = jnp.max(logits, axis=-1, keepdims=True)                   # (B, 1)
    # exp(-1e30 - m) underflows cleanly to 0 in f32 (do not switch the pad value to -inf).
    lse = m + jnp.log(jnp.sum(jnp.exp(logits - m), axis=-1, keepdims=True))   # (B, 1)
    tgt = jnp.sum(jnp.where(col == labels, logits, 0.0), axis=-1, keepdims=True)  # (B, 1)
    valid = (labels != -100).astype(jnp.float32)                  # (B, 1)

    num = jnp.sum((lse - tgt) * valid)                            # scalar
    den = jnp.sum(valid)                                          # scalar
    # Mean over valid rows.  If every label is -100 this is 0/0 = NaN, exactly like
    # torch.nn.CrossEntropyLoss(ignore_index=-100, reduction='mean').
    loss_ref[0] = num / den


def prepare_chart_head_params(weight, bias):
    """One-time parameter prep (do this once after loading/updating weights, NOT per forward).

    weight: (C, H) chart_classifier.weight
    bias:   (C,)   chart_classifier.bias
    Returns (w_t (H, Cp) native dtype, b_p (1, Cp) f32 with -1e30 in padded columns, C).
    """
    C, H = weight.shape
    Cp = ((C + 127) // 128) * 128  # lane-dense output width
    w_t = jnp.zeros((H, Cp), weight.dtype).at[:, :C].set(weight.T)
    b_p = jnp.full((1, Cp), -1e30, jnp.float32).at[0, :C].set(bias.astype(jnp.float32))
    return w_t, b_p, C


def chart_head(enc_cls_hidden, w_t, b_p, n_classes, chart_label):
    """Runs the fused Pallas kernel. Returns (logits_chart (B, C), loss scalar).

    w_t / b_p must come from prepare_chart_head_params (pre-transposed, lane-padded).
    """
    B, _ = enc_cls_hidden.shape
    Cp = w_t.shape[1]
    labels = chart_label.astype(jnp.int32).reshape(B, 1)

    logits_p, loss = pl.pallas_call(
        _chart_head_kernel,
        in_specs=[
            pl.BlockSpec(memory_space=pltpu.MemorySpace.VMEM),   # x (native dtype, no cast)
            pl.BlockSpec(memory_space=pltpu.MemorySpace.VMEM),   # weight^T (pre-padded)
            pl.BlockSpec(memory_space=pltpu.MemorySpace.VMEM),   # bias (pre-padded)
            pl.BlockSpec(memory_space=pltpu.MemorySpace.VMEM),   # labels (B, 1) int32
        ],
        out_specs=(
            pl.BlockSpec(memory_space=pltpu.MemorySpace.VMEM),   # lane-dense logits
            pl.BlockSpec(memory_space=pltpu.MemorySpace.SMEM),   # scalar loss
        ),
        out_shape=(
            jax.ShapeDtypeStruct((B, Cp), jnp.float32),
            jax.ShapeDtypeStruct((1,), jnp.float32),
        ),
    )(enc_cls_hidden, w_t, b_p, labels)

    return logits_p[:, :n_classes], loss[0]


def net_forward(enc_cls_hidden, w_t, b_p, n_classes, chart_label, sequences,
                max_label_length, training=False):
    """Mirrors Net.forward's output dict for the translatable part."""
    # TODO(synk): backbone.generate(...) (pretrained Pix2Struct encoder/decoder + beam search)
    # has no clean Pallas equivalent; `enc_cls_hidden` / `sequences` stand in for
    # predictions.encoder_hidden_states[-1][:, 0] and predictions.sequences.
    logits_chart, loss = chart_head(enc_cls_hidden, w_t, b_p, n_classes, chart_label)
    outputs = {"loss": loss}
    if not training:
        # F.pad(logits_table, (0, max_label_length - S), value=0) -- pure glue padding.
        pad_amt = max_label_length - sequences.shape[1]
        logits_table = jnp.pad(sequences, ((0, 0), (0, pad_amt)),
                               mode="constant", constant_values=0)
        outputs["logits_table"] = logits_table
        outputs["logits_chart"] = logits_chart
    return outputs


def _ref_ce(logits, labels):
    """Pure-JAX reference of CrossEntropyLoss(ignore_index=-100, reduction='mean')."""
    valid = labels != -100
    lse = jax.nn.logsumexp(logits, axis=-1)
    safe_lab = jnp.where(valid, labels, 0)
    tgt = jnp.take_along_axis(logits, safe_lab[:, None], axis=-1)[:, 0]
    per_row = jnp.where(valid, lse - tgt, 0.0)
    return jnp.sum(per_row) / jnp.sum(valid).astype(jnp.float32)


if __name__ == "__main__":
    key = jax.random.PRNGKey(0)
    B = 2                  # batch
    H = 32                 # backbone.config.vision_config.hidden_size (small stand-in)
    C = 5                  # len(cfg.chart_map)
    S_GEN = 6              # length of generated sequences
    MAX_LABEL_LENGTH = 8   # cfg.max_label_length

    k_x, k_w, k_seq = jax.random.split(key, 3)
    # Stand-in for predictions.encoder_hidden_states[-1][:, 0]; Pix2Struct runs in bf16.
    enc_cls_hidden = jax.random.normal(k_x, (B, H), jnp.bfloat16)
    # chart_classifier parameters (Linear(H -> C, bias=True))
    weight = jax.random.normal(k_w, (C, H), jnp.bfloat16) * 0.02
    bias = jnp.linspace(-0.1, 0.1, C).astype(jnp.float32)
    # batch['chart_label']
    chart_label = jnp.array([1, 3], jnp.int32)
    # Stand-in for predictions.sequences (generated token ids)
    sequences = jax.random.randint(k_seq, (B, S_GEN), 0, 100, jnp.int32)

    # One-time parameter preparation (hoisted out of the per-call wrapper).
    w_t, b_p, n_classes = prepare_chart_head_params(weight, bias)

    outputs = net_forward(enc_cls_hidden, w_t, b_p, n_classes, chart_label, sequences,
                          MAX_LABEL_LENGTH, training=False)
    outputs = jax.tree_util.tree_map(jax.block_until_ready, outputs)

    # Reference computed in f32 from the same bf16-quantized values.
    x32 = enc_cls_hidden.astype(jnp.float32)
    w32 = weight.astype(jnp.float32)
    ref_logits = x32 @ w32.T + bias
    ref_loss = _ref_ce(ref_logits, chart_label)

    assert outputs["logits_chart"].shape == (B, C)
    assert outputs["logits_table"].shape == (B, MAX_LABEL_LENGTH)
    assert jnp.all(outputs["logits_table"][:, S_GEN:] == 0)
    assert jnp.allclose(outputs["logits_chart"], ref_logits, atol=1e-3, rtol=1e-3)
    assert jnp.allclose(outputs["loss"], ref_loss, atol=1e-3, rtol=1e-3)

    # Exercise the ignore_index=-100 path.
    chart_label_ign = jnp.array([2, -100], jnp.int32)
    outputs_ign = net_forward(enc_cls_hidden, w_t, b_p, n_classes, chart_label_ign, sequences,
                              MAX_LABEL_LENGTH, training=False)
    outputs_ign = jax.tree_util.tree_map(jax.block_until_ready, outputs_ign)
    ref_loss_ign = _ref_ce(ref_logits, chart_label_ign)
    assert jnp.allclose(outputs_ign["loss"], ref_loss_ign, atol=1e-3, rtol=1e-3)
    assert jnp.allclose(outputs_ign["logits_chart"], ref_logits, atol=1e-3, rtol=1e-3)

    print("KERNEL_OK")
</pallas_src>

<mosaic_0001>
module attributes {stable_mosaic.version = 11 : i64} {
  func.func @_chart_head_kernel(%arg0: memref<2x32xbf16, #tpu.memory_space<vmem>>, %arg1: memref<32x128xbf16, #tpu.memory_space<vmem>>, %arg2: memref<1x128xf32, #tpu.memory_space<vmem>>, %arg3: memref<2x1xi32, #tpu.memory_space<vmem>>, %arg4: memref<2x128xf32, #tpu.memory_space<vmem>>, %arg5: memref<1xf32, #tpu.memory_space<smem>>) attributes {dimension_semantics = [], scalar_prefetch = 0 : i64, scratch_operands = 0 : i64, tpu.core_type = #tpu.core_type<tc>} {
    %c0 = arith.constant 0 : index
    %c0_0 = arith.constant 0 : index
    %0 = vector.load %arg0[%c0, %c0_0] : memref<2x32xbf16, #tpu.memory_space<vmem>>, vector<2x32xbf16>
    %c0_1 = arith.constant 0 : index
    %c0_2 = arith.constant 0 : index
    %1 = vector.load %arg1[%c0_1, %c0_2] : memref<32x128xbf16, #tpu.memory_space<vmem>>, vector<32x128xbf16>
    %cst = arith.constant dense<0.000000e+00> : vector<2x128xf32>
    %2 = tpu.matmul %0, %1, %cst {dimension_numbers = #tpu.dot_dimension_numbers<[1], [0], [0], [1], [0, 0, 1, 1], [], []>} : vector<2x32xbf16>, vector<32x128xbf16>, vector<2x128xf32> -> vector<2x128xf32>
    %c0_3 = arith.constant 0 : index
    %c0_4 = arith.constant 0 : index
    %3 = vector.load %arg2[%c0_3, %c0_4] : memref<1x128xf32, #tpu.memory_space<vmem>>, vector<1x128xf32>
    %4 = vector.broadcast %3 : vector<1x128xf32> to vector<2x128xf32>
    %5 = arith.addf %2, %4 : vector<2x128xf32>
    %c0_5 = arith.constant 0 : index
    %c0_6 = arith.constant 0 : index
    %6 = vector.load %arg4[%c0_5, %c0_6] : memref<2x128xf32, #tpu.memory_space<vmem>>, vector<2x128xf32>
    tpu.vector_store %arg4[%c0_5, %c0_6], %5 {strides = array<i32>} : memref<2x128xf32, #tpu.memory_space<vmem>>, vector<2x128xf32>,
    %c0_7 = arith.constant 0 : index
    %c0_8 = arith.constant 0 : index
    %7 = vector.load %arg3[%c0_7, %c0_8] : memref<2x1xi32, #tpu.memory_space<vmem>>, vector<2x1xi32>
    %8 = tpu.iota {dimensions = array<i32: 1>} : vector<2x128xi32>
    %cst_9 = arith.constant dense<0xFF800000> : vector<2xf32>
    %9 = vector.multi_reduction <maximumf>, %5, %cst_9 [1] : vector<2x128xf32> to vector<2xf32>
    %10 = vector.shape_cast %9 : vector<2xf32> to vector<2x1xf32>
    %11 = vector.broadcast %10 : vector<2x1xf32> to vector<2x128xf32>
    %12 = arith.subf %5, %11 : vector<2x128xf32>
    %13 = math.exp %12 : vector<2x128xf32>
    %cst_10 = arith.constant dense<0.000000e+00> : vector<2xf32>
    %14 = vector.multi_reduction <add>, %13, %cst_10 [1] : vector<2x128xf32> to vector<2xf32>
    %15 = vector.shape_cast %14 : vector<2xf32> to vector<2x1xf32>
    %16 = math.log %15 : vector<2x1xf32>
    %17 = arith.addf %10, %16 : vector<2x1xf32>
    %18 = vector.broadcast %7 : vector<2x1xi32> to vector<2x128xi32>
    %19 = arith.cmpi eq, %8, %18 : vector<2x128xi32>
    %cst_11 = arith.constant 0.000000e+00 : f32
    %20 = vector.broadcast %cst_11 : f32 to vector<2x128xf32>
    %21 = arith.select %19, %5, %20 : vector<2x128xi1>, vector<2x128xf32>
    %cst_12 = arith.constant dense<0.000000e+00> : vector<2xf32>
    %22 = vector.multi_reduction <add>, %21, %cst_12 [1] : vector<2x128xf32> to vector<2xf32>
    %23 = vector.shape_cast %22 : vector<2xf32> to vector<2x1xf32>
    %c-100_i32 = arith.constant -100 : i32
    %24 = vector.broadcast %c-100_i32 : i32 to vector<2x1xi32>
    %25 = arith.cmpi ne, %7, %24 : vector<2x1xi32>
    %26 = arith.extui %25 : vector<2x1xi1> to vector<2x1xi32>
    %27 = arith.sitofp %26 : vector<2x1xi32> to vector<2x1xf32>
    %28 = arith.subf %17, %23 : vector<2x1xf32>
    %29 = arith.mulf %28, %27 : vector<2x1xf32>
    %30 = vector.shape_cast %29 : vector<2x1xf32> to vector<1x2x1xf32>
    %cst_13 = arith.constant dense<0.000000e+00> : vector<1xf32>
    %31 = vector.multi_reduction <add>, %30, %cst_13 [1, 2] : vector<1x2x1xf32> to vector<1xf32>
    %32 = vector.shape_cast %31 : vector<1xf32> to vector<1x1x1xf32>
    %33 = vector.extract %32[0, 0, 0] : f32 from vector<1x1x1xf32>
    %34 = vector.shape_cast %27 : vector<2x1xf32> to vector<1x2x1xf32>
    %cst_14 = arith.constant dense<0.000000e+00> : vector<1xf32>
    %35 = vector.multi_reduction <add>, %34, %cst_14 [1, 2] : vector<1x2x1xf32> to vector<1xf32>
    %36 = vector.shape_cast %35 : vector<1xf32> to vector<1x1x1xf32>
    %37 = vector.extract %36[0, 0, 0] : f32 from vector<1x1x1xf32>
    %38 = arith.divf %33, %37 : f32
    %c0_15 = arith.constant 0 : index
    %39 = memref.load %arg5[%c0_15] : memref<1xf32, #tpu.memory_space<smem>>
    memref.store %38, %arg5[%c0_15] : memref<1xf32, #tpu.memory_space<smem>>
    return
  }
}

</mosaic_0001>

<bundles_post_ra>
// kernel: tpu_custom_call.1
= control target key start
LH: loop header
LB: loop body
LE: loop exit
PB: predicated region body
PF: predicated region fallthrough
CT: control target
= control target key end

     0   :  { %11 = vsyncpa [#allocation3], 0  ;;  %s341_s0 = inlined_call_operand.vmem [shape: bf16[2,32], index: 0, kind: input, shape index: {}]   ;;  %s342_s1 = inlined_call_operand.hbm [shape: bf16[32,128], index: 1, kind: input, shape index: {}]   ;;  %s343_s2 = inlined_call_operand.vmem [shape: f32[1,128], index: 2, kind: input, shape index: {}]   ;;  %s344_s3 = inlined_call_operand.vmem [shape: s32[2,1], index: 3, kind: input, shape index: {}]   ;;  %s345_s4 = inlined_call_operand.hbm [shape: f32[2,128], index: 4, kind: output, shape index: {0}]   ;;  %s346_s5 = inlined_call_operand.hbm [shape: f32[1], index: 5, kind: output, shape index: {1}]  }
   0x1   :  { %12 = vsyncpa [#allocation4], 0 }
   0x2   :  { %13 = vsyncpa [#allocation5], 0  ;;  %s282_s18 = smov [#allocation2]  }
   0x3   :  { %s21_s19 = sshll.u32 %s282_s18, 4  ;;  %s22_s19 = int_to_ptr.vmem [resolvable:$true] %s21_s19 }
   0x4   :  { %s236_s20 = scalar_lea.vmem %s22_s19, 256  ;;  %p241_p1 = scmp.lt.s32.totalorder %s22_s19, %s22_s19 }
   0x5   :  { %p237_p0 = scmp.ne.s32.totalorder %s22_s19, %s236_s20  ;;  %p242_p2 = scmp.lt.s32.totalorder %s236_s20, %s236_s20 }
   0x7   :  { %p243_p3 = por %p242_p2, %p241_p1 }
   0x9   :  { %p244_p4 = pnand %p243_p3, %p237_p0 }
   0xb   :  { %247 = shalt.err (!%p244_p4)
}
   0xc   :  { %s283_s21 = smov 64   ;;  %s284_s22 = smov 4  }
   0xd   :  { %27 = dma.hbm_to_vmem [thread:$0]  %s342_s1, 256, %s22_s19, [#allocation3], %s283_s21, %s283_s21, %s284_s22  }
   0xe   :  { %276 = dma.done.wait [#allocation3], 256  }
   0xf   :  { %277 = vsyncadd [#allocation3], 4294967040  ;;  %v285_v0 = vmov 0.0   ;;  %vm286_vm0 = vmmov 0   ;;  %v220_v1 = vld [vmem:[#allocation2 + $0x8] sm:$0xff]   ;;  %v221_v2 = vld [vmem:[#allocation2] sm:$0xff]   ;;  %v106_v16 = vlaneseq }
  0x10   :  { %197 = vmatprep.subr.bf16.mxu0 %v285_v0  ;;  %201 = vmatprep.mubr.msk.bf16.mxu0 %vm286_vm0, %v285_v0  ;;  %v36_v3 = vld [vmem:[%s341_s0] sm:$0x1]  ;;  %vm60_vm1 = vcmask 261120   ;;  %v287_v4 = vmov 0   ;;  %vm108_vm2 = vcmask 1041408   ;;  %vm134_vm5 = vcmask 1024  }
  0x11   :  { %198 = vmatpush3.bf16.msra.mxu0 %v220_v1  ;;  %219 = vset.pattern.permute.xlu0 %v287_v4  ;;  %v189_v5 = vld [vmem:[%s343_s2] ss:$0 sm:$0xff]  ;;  %v107_v17 = vand.u32 127, %v106_v16  ;;  %s288_s2 = smov [#allocation6]  }
  0x12   :  { %199 = vmatprep.subr.bf16.mxu0 %v285_v0  ;;  %v105_v12 = vld [vmem:[%s344_s3] sm:$0x3]  ;;  %s167_s3 = sshll.u32 %s288_s2, 4  ;;  %s168_s3 = int_to_ptr.vmem [resolvable:$true] %s167_s3 }
  0x13   :  { %vm129_vm4 = vcmp.ne.s32.totalorder %v105_v12, 4294967196  ;;  %s248_s29 = scalar_lea.vmem %s168_s3, 32  ;;  %p253_p6 = scmp.lt.s32.totalorder %s168_s3, %s168_s3 }
  0x14   :  { %v193_v28 = vsel %vm129_vm4, 1.0, %v285_v0  ;;  %p249_p5 = scmp.ne.s32.totalorder %s168_s3, %s248_s29  ;;  %p254_p7 = scmp.lt.s32.totalorder %s248_s29, %s248_s29 }
  0x15   :  { %200 = vmatpush3.bf16.msra.mxu0 %v221_v2  ;;  %v145_v32 = vsel %vm134_vm5, %v193_v28, 0.0 }
  0x16   :  { %p255_p8 = por %p254_p7, %p253_p6 }
  0x18   :  { %202 = vmatmul.mubr.msk.bf16.vlgmr.msra.gmra.mxu0 %vm60_vm1, %v36_v3  ;;  %p256_p9 = pnand %p255_p8, %p249_p5 }
  0xd8   :  { %v98_v6 = vpop.f32.mrf.mxu0 }
  0xd9   :  { %v99_v7 = vadd.f32 %v189_v5, %v98_v6 }
  0xda   :  { %v203_v8 = vpop.f32.mrf.mxu0 }
  0xdb   :  { %104 = vst [vmem:[#allocation6] sm:$0x3] %v99_v7  ;;  %v109_v9 = vsel %vm108_vm2, %v99_v7, -inf }
  0xdc   :  { %110 = vmax.xlane.f32.xlu0 %v109_v9  ;;  %v101_v10 = vpop.f32.mrf.mxu0 }
  0xde   :  { %v204_v11 = vpop.f32.mrf.mxu0 }
  0xf2   :  { %122 = vperm.xlu0 %219, %v105_v12  }
 0x165   :  { %v111_v13 = vpop.xlane.xlu0 %110 }
 0x166   :  { %v112_v14 = vsub.f32 %v99_v7, %v111_v13 }
 0x168   :  { %v113_v15 = vmul.f32 1.442695, %v112_v14 }
 0x16a   :  { %222 = vpow2.f32 %v113_v15 }
 0x16d   :  { %v123_v18 = vpop.permute.xlu0 %122 }
 0x16e   :  { %vm124_vm3 = vcmp.eq.s32.totalorder %v107_v17, %v123_v18 }
 0x16f   :  { %v125_v21 = vsel %vm124_vm3, %v99_v7, 0.0 }
 0x170   :  { %v126_v22 = vsel %vm108_vm2, %v125_v21, 0.0 }
 0x177   :  { %v223_v19 = vpop.eup %222 }
 0x178   :  { %v115_v20 = vsel %vm108_vm2, %v223_v19, 0.0 }
 0x179   :  { %116 = vadd.xlane.f32.xlu1 %v115_v20 }
 0x17d   :  { %127 = vadd.xlane.f32.xlu1 %v126_v22 }
 0x202   :  { %v117_v23 = vpop.xlane.xlu1 %116 }
 0x203   :  { %224 = vlog2.f32 %v117_v23 }
 0x206   :  { %v128_v27 = vpop.xlane.xlu1 %127 }
 0x210   :  { %v225_v24 = vpop.eup %224 }
 0x211   :  { %v119_v25 = vmul.f32 0.6931472, %v225_v24 }
 0x213   :  { %v120_v26 = vadd.f32 %v119_v25, %v111_v13 }
 0x215   :  { %v132_v29 = vsub.f32 %v120_v26, %v128_v27 }
 0x217   :  { %v133_v30 = vmul.f32 %v193_v28, %v132_v29 }
 0x219   :  { %v135_v31 = vsel %vm134_vm5, %v133_v30, 0.0 }
 0x21a   :  { %136 = vadd.xlane.f32.xlu1 %v135_v31 }
 0x21e   :  { %146 = vadd.xlane.f32.xlu1 %v145_v32 }
 0x2a3   :  { %v137_v33 = vpop.xlane.xlu1 %136 }
 0x2a4   :  { %v138_v34 = vrot.slane %v137_v33, 4 }
 0x2a6   :  { %v139_v35 = vadd.f32 %v138_v34, %v137_v33 }
 0x2a7   :  { %v147_v36 = vpop.xlane.xlu1 %146 }
 0x2a8   :  { %v140_v37 = vrot.slane %v139_v35, 2  ;;  %v148_v38 = vrot.slane %v147_v36, 4 }
 0x2aa   :  { %v149_v39 = vadd.f32 %v148_v38, %v147_v36  ;;  %v141_v40 = vadd.f32 %v140_v37, %v139_v35 }
 0x2ab   :  { %259 = shalt.err (!%p256_p9)
}
 0x2ac   :  { %170 = dma.vmem_to_hbm [thread:$0]  %s168_s3, 32, %s345_s4, [#allocation4]   ;;  %v150_v41 = vrot.slane %v149_v39, 2  ;;  %v142_v42 = vrot.slane %v141_v40, 1 }
 0x2ad   :  { %s289_s11 = smov [#allocation7]  }
 0x2ae   :  { %v151_v43 = vadd.f32 %v150_v41, %v149_v39  ;;  %v143_v44 = vadd.f32 %v142_v42, %v141_v40 }
 0x2b0   :  { %205 = vpush %v143_v44  ;;  %v152_v45 = vrot.slane %v151_v43, 1 }
 0x2b2   :  { %v153_v46 = vadd.f32 %v152_v45, %v151_v43 }
 0x2b4   :  { %207 = vpush %v153_v46 }
 0x2e1   :  { %s206_s7 = spop %205 }
 0x2e5   :  { %s208_s8 = spop %207 }
 0x2e6   :  { %v155_v47 = vstv %s208_s8 }
 0x2e7   :  { %226 = vrcp.f32 %v155_v47 }
 0x2f4   :  { %v227_v48 = vpop.eup %226 }
 0x2f5   :  { %209 = vpush %v227_v48 }
 0x326   :  { %s210_s9 = spop %209 }
 0x327   :  { %s158_s10 = smul.f32 %s210_s9, %s206_s7 }
 0x329   :  { %160 = sst [smem:[#allocation7]] %s158_s10 }
 0x32a   :  { %178 = dma.smem_to_hbm %s289_s11, 16, %s346_s5, [#allocation5]  }
 0x32b   :  { %278 = dma.done.wait [#allocation4], 32  }
 0x32c   :  { %279 = vsyncadd [#allocation4], 4294967264 }
 0x32d   :  { %280 = dma.done.wait [#allocation5], 16  }
 0x32e   :  { %281 = vsyncadd [#allocation5], 4294967280 }
 0x32f   :  { %185 = sfence }
 0x330   :  { %186 = vsyncpa [#allocation3], 1 }
 0x331   :  { %187 = vsyncpa [#allocation4], 1 }
 0x332   :  { %188 = vsyncpa [#allocation5], 1 }

</bundles_post_ra>
